<compile_context>
chip_gen: v5e
topology: v5e:2x2
jax: 0.10.0
libtpu: 0.0.40
codegen_flags: <defaults>
</compile_context>

<pallas_src>
import functools
import math

import jax
import jax.numpy as jnp
from jax.experimental import pallas as pl
from jax.experimental.pallas import tpu as pltpu


# ----------------------------- Pallas kernel -------------------------------

def _cat_kernel(x_ref, y_ref, o_ref, *, split):
    # x tile -> left part of the output tile, y tile -> right part.
    # `split` is static, so these are zero-cost static ref views.
    o_ref[:, :split] = x_ref[...]
    o_ref[:, split:] = y_ref[...]


# ----------------------------- tiling helper --------------------------------

def _choose_tile_m(M, bytes_per_row, budget=24 * 1024 * 1024):
    """Largest M-tile whose double-buffered in+out traffic fits the budget.

    Budget is chosen against v7x's VMEM (64 MiB physical); trivially fits
    v5e/v6e (128 MiB).  Returns either the full extent (always legal) or a
    multiple of 8 (sublane requirement); the ragged edge block is clipped by
    Pallas, so no jnp.pad of the operands is ever needed.
    """
    tm_cap = budget // max(1, 2 * bytes_per_row)   # 2x for double-buffering
    if tm_cap >= M or M <= 8:
        return M
    return max(8, (tm_cap // 8) * 8)


# ------------------------------ Pallas wrapper -------------------------------

def _pallas_cat2d(x2, y2):
    """Row-wise concat of two 2-D arrays: out[i] = [x2[i], y2[i]]."""
    M, A = x2.shape
    M2, B = y2.shape
    assert M == M2 and x2.dtype == y2.dtype
    C = A + B
    dt = x2.dtype
    itemsize = jnp.dtype(dt).itemsize
    bytes_per_row = itemsize * (A + B + C)         # inputs + output per row
    tm = _choose_tile_m(M, bytes_per_row)
    grid = (pl.cdiv(M, tm),)

    kernel = functools.partial(_cat_kernel, split=A)
    return pl.pallas_call(
        kernel,
        out_shape=jax.ShapeDtypeStruct((M, C), dt),
        grid_spec=pltpu.PrefetchScalarGridSpec(
            num_scalar_prefetch=0,
            grid=grid,
            in_specs=[pl.BlockSpec((tm, A), lambda i: (i, 0)),
                      pl.BlockSpec((tm, B), lambda i: (i, 0))],
            out_specs=pl.BlockSpec((tm, C), lambda i: (i, 0))),
        compiler_params=pltpu.CompilerParams(
            dimension_semantics=("parallel",),
            vmem_limit_bytes=48 * 1024 * 1024),
    )(x2, y2)


def my_cat(x, y, dim):
    """torch.cat((x, y), dim) equivalent."""
    assert x.dtype == y.dtype, "torch.cat requires matching dtypes"
    nd = x.ndim
    assert y.ndim == nd
    d = dim % nd
    assert x.shape[:d] == y.shape[:d] and x.shape[d + 1:] == y.shape[d + 1:], \
        "all dims except the concat dim must match"

    outer = math.prod(x.shape[:d]) if d > 0 else 1
    inner = math.prod(x.shape[d + 1:]) if d < nd - 1 else 1

    # Flatten so the concat axis (times everything after it) is the lane axis.
    x2 = x.reshape(outer, x.shape[d] * inner)
    y2 = y.reshape(outer, y.shape[d] * inner)
    out2 = _pallas_cat2d(x2, y2)

    out_shape = x.shape[:d] + (x.shape[d] + y.shape[d],) + x.shape[d + 1:]
    return out2.reshape(out_shape)


# ----------------------------------- main ------------------------------------

if __name__ == "__main__":
    key = jax.random.PRNGKey(0)
    k1, k2 = jax.random.split(key)

    # Case 1: channel concat (the way MyCat(1) is used in MeonLQ.py).
    x = jax.random.normal(k1, (2, 4, 16, 16), jnp.float32)
    y = jax.random.normal(k2, (2, 4, 16, 16), jnp.float32)
    cat_c = jax.jit(functools.partial(my_cat, dim=1))
    out1 = cat_c(x, y)
    jax.block_until_ready(out1)
    ref1 = jnp.concatenate([x, y], axis=1)
    assert out1.shape == (2, 8, 16, 16), out1.shape
    assert bool(jnp.array_equal(out1, ref1))

    # Case 2: last-dim concat (exercises the M-tiled path, M = 2*4*16 = 128).
    cat_last = jax.jit(functools.partial(my_cat, dim=-1))
    out2 = cat_last(x, y)
    jax.block_until_ready(out2)
    ref2 = jnp.concatenate([x, y], axis=-1)
    assert out2.shape == (2, 4, 16, 32), out2.shape
    assert bool(jnp.array_equal(out2, ref2))

    print("KERNEL_OK")
</pallas_src>

<mosaic_0001>
module attributes {stable_mosaic.version = 11 : i64} {
  func.func @_cat_kernel(%arg0: i32, %arg1: memref<2x1024xf32, #tpu.memory_space<vmem>>, %arg2: memref<2x1024xf32, #tpu.memory_space<vmem>>, %arg3: memref<2x2048xf32, #tpu.memory_space<vmem>>) attributes {dimension_semantics = [#tpu.dimension_semantics<parallel>], iteration_bounds = array<i64: 1>, scalar_prefetch = 0 : i64, scratch_operands = 0 : i64, tpu.core_type = #tpu.core_type<tc>, window_params = [{transform_indices = @transform_0, window_bounds = array<i64: 2, 1024>}, {transform_indices = @transform_1, window_bounds = array<i64: 2, 1024>}, {transform_indices = @transform_2, window_bounds = array<i64: 2, 2048>}]} {
    %c0 = arith.constant 0 : index
    %c0_0 = arith.constant 0 : index
    %0 = vector.load %arg1[%c0, %c0_0] : memref<2x1024xf32, #tpu.memory_space<vmem>>, vector<2x1024xf32>
    %c0_1 = arith.constant 0 : index
    %c0_2 = arith.constant 0 : index
    %1 = vector.load %arg3[%c0_1, %c0_2] : memref<2x2048xf32, #tpu.memory_space<vmem>>, vector<2x1024xf32>
    tpu.vector_store %arg3[%c0_1, %c0_2], %0 {strides = array<i32>} : memref<2x2048xf32, #tpu.memory_space<vmem>>, vector<2x1024xf32>,
    %c0_3 = arith.constant 0 : index
    %c0_4 = arith.constant 0 : index
    %2 = vector.load %arg2[%c0_3, %c0_4] : memref<2x1024xf32, #tpu.memory_space<vmem>>, vector<2x1024xf32>
    %c0_5 = arith.constant 0 : index
    %c1024 = arith.constant 1024 : index
    %3 = vector.load %arg3[%c0_5, %c1024] : memref<2x2048xf32, #tpu.memory_space<vmem>>, vector<2x1024xf32>
    tpu.vector_store %arg3[%c0_5, %c1024], %2 {strides = array<i32>} : memref<2x2048xf32, #tpu.memory_space<vmem>>, vector<2x1024xf32>,
    return
  }
  func.func @transform_0(%arg0: i32) -> (i32, i32) {
    %c0_i32 = arith.constant 0 : i32
    %c0_i32_0 = arith.constant 0 : i32
    return %arg0, %c0_i32 : i32, i32
  }
  func.func @transform_1(%arg0: i32) -> (i32, i32) {
    %c0_i32 = arith.constant 0 : i32
    %c0_i32_0 = arith.constant 0 : i32
    return %arg0, %c0_i32 : i32, i32
  }
  func.func @transform_2(%arg0: i32) -> (i32, i32) {
    %c0_i32 = arith.constant 0 : i32
    %c0_i32_0 = arith.constant 0 : i32
    return %arg0, %c0_i32 : i32, i32
  }
}

</mosaic_0001>

<bundles_post_ra>
// kernel: my_cat.1
= control target key start
LH: loop header
LB: loop body
LE: loop exit
PB: predicated region body
PF: predicated region fallthrough
CT: control target
= control target key end

     0   :  { %s62_s0 = inlined_call_operand.vmem [shape: f32[2,1024], index: 0, kind: input, shape index: {}]   ;;  %s63_s2 = inlined_call_operand.vmem [shape: f32[2,2048], index: 2, kind: output, shape index: {}]   ;;  %s64_s1 = inlined_call_operand.vmem [shape: f32[2,1024], index: 1, kind: input, shape index: {}]  }
   0x1   :  { %v11_v0 = vld [vmem:[%s62_s0] sm:$0xff]  ;;  %v12_v1 = vld [vmem:[%s62_s0 + $0x8] sm:$0xff] }
   0x2   :  { %v15_v2 = vld [vmem:[%s64_s1] sm:$0xff]  ;;  %13 = vst [vmem:[%s63_s2] sm:$0xff] %v11_v0  ;;  %v16_v3 = vld [vmem:[%s64_s1 + $0x8] sm:$0xff] }
   0x3   :  { %14 = vst [vmem:[%s63_s2 + $0x8] sm:$0xff] %v12_v1 }
   0x4   :  { %17 = vst [vmem:[%s63_s2 + $0x10] sm:$0xff] %v15_v2 }
   0x5   :  { %18 = vst [vmem:[%s63_s2 + $0x18] sm:$0xff] %v16_v3 }

</bundles_post_ra>
